<compile_context>
chip_gen: v7x
topology: tpu7x:2x2x1
jax: 0.10.0
libtpu: 0.0.40
codegen_flags: <defaults>
</compile_context>

<pallas_src>
import jax
import jax.numpy as jnp
from jax.experimental import pallas as pl
from jax.experimental.pallas import tpu as pltpu


def _round_up(a, b):
    return ((a + b - 1) // b) * b


def _recurrence_coefficients(K):
    """Coefficients (a_k, b_k) such that Tx_k = a_k * x + b_k * (diag ⊙ x).

    Mirrors the PyTorch forward exactly (the loop applies unlaplacian to x, never to
    Tx_1, so the whole recurrence stays in span{x, dx}).
    """
    terms = [(1.0, 0.0)]          # Tx_0 = x, consumed by lins[0]
    c_prev0 = (1.0, 0.0)          # Tx_0
    c_prev1 = (1.0, 0.0)          # Tx_1 initialised to x
    if K > 1:
        c_prev1 = (0.0, 1.0)      # Tx_1 = dx
        terms.append(c_prev1)
    for _ in range(2, K):
        c2 = (-c_prev0[0], 2.0 - c_prev0[1])   # Tx_2 = 2*dx - Tx_0
        terms.append(c2)
        c_prev0, c_prev1 = c_prev1, c2
    alphas = [t[0] for t in terms]
    betas = [t[1] for t in terms]
    return alphas, betas


def spectral_gnn_kernel(xp_ref, dp_ref, w_ref, s_ref, b_ref, out_ref):
    """One packed-row tile of the collapsed forward.

    xp_ref:  (TP, R*Cin)    R logical rows lane-packed per packed row
    dp_ref:  (TP, R)        diag(L_star) value per logical row (packed)
    w_ref:   (R*Cin, 2*PC)  [kron(I,Wx) | kron(I,Wd)]   (resident)
    s_ref:   (R, PC)        0/1 expander: d (TP,R) -> per-lane multiplier (TP,PC) (resident)
    b_ref:   (1, PC)        bias tiled R times                                    (resident)
    out_ref: (TP, PC)       PC = R*Cout, multiple of 128 -> unmasked full-lane stores
    """
    pc = out_ref.shape[-1]
    xp = xp_ref[...]
    # One MXU matmul (128-deep contraction, shared LHS) produces both the x-term and
    # the dx-term, f32 accumulation; K-independent.
    z = jnp.dot(xp, w_ref[...], preferred_element_type=jnp.float32)   # (TP, 2*PC)
    y = z[:, :pc]          # x @ Wx   (lane-aligned slice)
    yd = z[:, pc:]         # x @ Wd
    # Expand packed d (TP,R) to a per-output-lane multiplier (TP,PC) with a tiny
    # MXU matmul against a 0/1 selection matrix (MXU has huge slack; avoids relayouts).
    m = jnp.dot(dp_ref[...], s_ref[...], preferred_element_type=jnp.float32)  # (TP, PC)
    out = y + m * yd + b_ref[...].astype(jnp.float32)
    out_ref[...] = out.astype(out_ref.dtype)


def spectral_gnn(x, L_star, weights, bias, *, block_rows=16384, out_dtype=None):
    """x: (B, N, Cin), L_star: (N, N), weights: (K, Cin, Cout) [stacked W.T], bias: (Cout,).

    I/O dtype follows x.dtype (pass bf16 for half the HBM traffic); matmuls accumulate
    in f32 inside the kernel. `out_dtype` overrides the output dtype (bf16 output is the
    single largest HBM lever when downstream tolerates it). `block_rows` is the number of
    LOGICAL rows (= batch*node) per grid step.
    """
    B, N, Cin = x.shape
    K, _, Cout = weights.shape
    M = B * N
    dtype = x.dtype
    out_dtype = jnp.dtype(dtype) if out_dtype is None else jnp.dtype(out_dtype)

    # ---- collapse the K-term recurrence into two combined weights (exact algebra) ----
    alphas, betas = _recurrence_coefficients(K)
    a = jnp.asarray(alphas, jnp.float32)
    b = jnp.asarray(betas, jnp.float32)
    w32 = weights.astype(jnp.float32)
    wx = jnp.einsum("k,kio->io", a, w32)          # (Cin, Cout) f32
    wd = jnp.einsum("k,kio->io", b, w32)          # (Cin, Cout) f32

    # ---- channel padding so the lane-packed layout is exactly 128-lane dense ----
    if Cin <= 128:
        Cin_p = int(pl.next_power_of_2(Cin))      # divides 128
        R = 128 // Cin_p                          # logical rows per packed row
    else:
        Cin_p = _round_up(Cin, 128)
        R = 1
    Cout_p = _round_up(Cout, max(1, 128 // R))    # ensures R*Cout_p % 128 == 0
    PC = R * Cout_p                               # packed output width (multiple of 128)

    if (Cin_p, Cout_p) != (Cin, Cout):
        pad = ((0, Cin_p - Cin), (0, Cout_p - Cout))
        wx = jnp.pad(wx, pad)
        wd = jnp.pad(wd, pad)
        bias_p = jnp.pad(bias.astype(jnp.float32), (0, Cout_p - Cout))
    else:
        bias_p = bias.astype(jnp.float32)

    # Block-diagonal weights -> one fused resident (R*Cin_p, 2*PC) weight.
    eye = jnp.eye(R, dtype=jnp.float32)
    w_fused = jnp.concatenate([jnp.kron(eye, wx), jnp.kron(eye, wd)], axis=1).astype(dtype)
    # 0/1 expander: (TP,R) @ (R,PC) replicates each d value across its Cout_p output lanes.
    s_expand = jnp.kron(eye, jnp.ones((1, Cout_p), jnp.float32)).astype(dtype)   # (R, PC)
    bias_pk = jnp.tile(bias_p, (R,)).reshape(1, PC).astype(dtype)                # (1, PC)

    # ---- lane-pack x and diag (row-major reshapes, free in HBM) ----
    Mp = _round_up(M, R)                          # packing requires M % R == 0
    x2 = x.reshape(M, Cin)
    d_flat = jnp.tile(jnp.diagonal(L_star), (B,))                                # (M,)
    if Mp != M or Cin_p != Cin:
        x2 = jnp.pad(x2, ((0, Mp - M), (0, Cin_p - Cin)))
    if Mp != M:
        d_flat = jnp.pad(d_flat, (0, Mp - M))
    Pp = Mp // R
    xp = x2.reshape(Pp, R * Cin_p).astype(dtype)                                 # (Pp, 128)
    dp = d_flat.reshape(Pp, R).astype(dtype)                                     # (Pp, R)

    # ---- tiling: 1-D grid over packed rows, double-buffered by Pallas ----
    sub = max(8, 32 // min(jnp.dtype(dtype).itemsize, jnp.dtype(out_dtype).itemsize))
    desired_tp = max(sub, block_rows // R)
    TP = Pp if desired_tp >= Pp else (desired_tp // sub) * sub
    grid = (pl.cdiv(Pp, TP),)

    x_bytes = jnp.dtype(dtype).itemsize
    o_bytes = jnp.dtype(out_dtype).itemsize
    cost = pl.CostEstimate(
        flops=2 * Pp * (R * Cin_p) * (2 * PC) + 2 * Pp * R * PC + 3 * Pp * PC,
        transcendentals=0,
        bytes_accessed=(Pp * (R * Cin_p + R)
                        + (R * Cin_p) * 2 * PC + R * PC + PC) * x_bytes
                       + Pp * PC * o_bytes,
    )

    out_packed = pl.pallas_call(
        spectral_gnn_kernel,
        out_shape=jax.ShapeDtypeStruct((Pp, PC), out_dtype),
        grid=grid,
        in_specs=[
            pl.BlockSpec((TP, R * Cin_p), lambda i: (i, 0)),     # packed x tile (128 lanes)
            pl.BlockSpec((TP, R), lambda i: (i, 0)),             # packed diag tile
            pl.BlockSpec((R * Cin_p, 2 * PC), lambda i: (0, 0)),  # fused weight (resident)
            pl.BlockSpec((R, PC), lambda i: (0, 0)),              # diag expander (resident)
            pl.BlockSpec((1, PC), lambda i: (0, 0)),              # packed bias (resident)
        ],
        out_specs=pl.BlockSpec((TP, PC), lambda i: (i, 0)),       # lane-dense output slab
        compiler_params=pltpu.CompilerParams(
            dimension_semantics=("parallel",),    # 2 TCs on v7x; no-op on v5e/v6e
            vmem_limit_bytes=48 * 1024 * 1024,    # <= physical VMEM on all generations
        ),
        cost_estimate=cost,
    )(xp, dp, w_fused, s_expand, bias_pk)

    # Free row-major reshape back; drop padded rows / padded output channels.
    out = out_packed.reshape(Mp, Cout_p)[:M, :Cout]
    return out.reshape(B, N, Cout)


def spectral_gnn_ref(x, L_star, weights, bias):
    """Pure-JAX reference mirroring the PyTorch forward term by term."""
    d = jnp.diagonal(L_star)
    dx = x * d[None, :, None]
    K = weights.shape[0]
    Tx_0 = x
    out = jnp.einsum("bnc,cd->bnd", x, weights[0])
    if K > 1:
        Tx_1 = dx
        out = out + jnp.einsum("bnc,cd->bnd", Tx_1, weights[1])
    for k in range(2, K):
        Tx_2 = 2.0 * dx - Tx_0
        out = out + jnp.einsum("bnc,cd->bnd", Tx_2, weights[k])
        Tx_0, Tx_1 = Tx_1, Tx_2
    return out + bias


if __name__ == "__main__":
    # Small shapes consistent with the module: batch=2, n_nodes=16, in=8, out=32, K=3.
    B, N, Cin, Cout, K = 2, 16, 8, 32, 3

    key = jax.random.PRNGKey(0)
    kx, kl, kw, kb = jax.random.split(key, 4)

    x = jax.random.normal(kx, (B, N, Cin), dtype=jnp.float32)
    L_star = jax.random.normal(kl, (N, N), dtype=jnp.float32)
    # Stored as (K, Cin, Cout) == stacked W.T so y = x @ W.T matches PyTorch Linear(bias=False).
    weights = jax.random.normal(kw, (K, Cin, Cout), dtype=jnp.float32) / jnp.sqrt(Cin)
    bias = jax.random.normal(kb, (Cout,), dtype=jnp.float32) * 0.1

    # ---- f32 path: tight check against the exact per-term reference ----
    out = spectral_gnn(x, L_star, weights, bias)
    jax.block_until_ready(out)
    ref = spectral_gnn_ref(x, L_star, weights, bias)
    assert out.shape == (B, N, Cout)
    assert jnp.allclose(out, ref, atol=1e-4, rtol=1e-4), "Pallas f32 output mismatch vs reference"

    # ---- odd shapes: channel padding, row padding, multi-step grid, partial last block ----
    B2, N2, Cin2, Cout2, K2 = 3, 50, 5, 20, 4
    k1, k2, k3, k4 = jax.random.split(jax.random.PRNGKey(1), 4)
    x2 = jax.random.normal(k1, (B2, N2, Cin2), dtype=jnp.float32)
    L2 = jax.random.normal(k2, (N2, N2), dtype=jnp.float32)
    w2 = jax.random.normal(k3, (K2, Cin2, Cout2), dtype=jnp.float32) / jnp.sqrt(Cin2)
    b2 = jax.random.normal(k4, (Cout2,), dtype=jnp.float32) * 0.1
    out2 = spectral_gnn(x2, L2, w2, b2, block_rows=128)   # force grid > 1 + partial block
    jax.block_until_ready(out2)
    ref2 = spectral_gnn_ref(x2, L2, w2, b2)
    assert out2.shape == (B2, N2, Cout2)
    assert jnp.allclose(out2, ref2, atol=1e-4, rtol=1e-4), "Pallas padded-path mismatch vs reference"

    # ---- bf16 I/O path (incl. bf16 OUTPUT — the dominant HBM stream); f32 MXU accumulation ----
    xb = x.astype(jnp.bfloat16)
    Lb = L_star.astype(jnp.bfloat16)
    wb = weights.astype(jnp.bfloat16)
    bb = bias.astype(jnp.bfloat16)
    out_bf = spectral_gnn(xb, Lb, wb, bb)
    jax.block_until_ready(out_bf)
    ref_bf = spectral_gnn_ref(
        xb.astype(jnp.float32), Lb.astype(jnp.float32),
        wb.astype(jnp.float32), bb.astype(jnp.float32))
    assert out_bf.dtype == jnp.bfloat16
    assert jnp.allclose(out_bf.astype(jnp.float32), ref_bf, atol=2e-1, rtol=1e-1), \
        "Pallas bf16 output mismatch vs reference"

    print("KERNEL_OK")
</pallas_src>

<mosaic_0001>
module attributes {stable_mosaic.version = 11 : i64} {
  func.func @spectral_gnn_kernel(%arg0: i32, %arg1: memref<2x128xf32, #tpu.memory_space<vmem>>, %arg2: memref<2x16xf32, #tpu.memory_space<vmem>>, %arg3: memref<128x1024xf32, #tpu.memory_space<vmem>>, %arg4: memref<16x512xf32, #tpu.memory_space<vmem>>, %arg5: memref<1x512xf32, #tpu.memory_space<vmem>>, %arg6: memref<2x512xf32, #tpu.memory_space<vmem>>) attributes {dimension_semantics = [#tpu.dimension_semantics<parallel>], iteration_bounds = array<i64: 1>, scalar_prefetch = 0 : i64, scratch_operands = 0 : i64, tpu.core_type = #tpu.core_type<tc>, window_params = [{transform_indices = @transform_0, window_bounds = array<i64: 2, 128>}, {transform_indices = @transform_1, window_bounds = array<i64: 2, 16>}, {pipeline_mode = #tpu.pipeline_mode<synchronous>, transform_indices = @transform_2, window_bounds = array<i64: 128, 1024>}, {pipeline_mode = #tpu.pipeline_mode<synchronous>, transform_indices = @transform_3, window_bounds = array<i64: 16, 512>}, {pipeline_mode = #tpu.pipeline_mode<synchronous>, transform_indices = @transform_4, window_bounds = array<i64: 1, 512>}, {transform_indices = @transform_5, window_bounds = array<i64: 2, 512>}]} {
    %c0 = arith.constant 0 : index
    %c0_0 = arith.constant 0 : index
    %0 = vector.load %arg1[%c0, %c0_0] : memref<2x128xf32, #tpu.memory_space<vmem>>, vector<2x128xf32>
    %c0_1 = arith.constant 0 : index
    %c0_2 = arith.constant 0 : index
    %1 = vector.load %arg3[%c0_1, %c0_2] : memref<128x1024xf32, #tpu.memory_space<vmem>>, vector<128x1024xf32>
    %cst = arith.constant dense<0.000000e+00> : vector<2x1024xf32>
    %2 = tpu.matmul %0, %1, %cst {dimension_numbers = #tpu.dot_dimension_numbers<[1], [0], [0], [1], [0, 0, 1, 1], [], []>} : vector<2x128xf32>, vector<128x1024xf32>, vector<2x1024xf32> -> vector<2x1024xf32>
    %3 = vector.extract_strided_slice %2 {offsets = [0, 0], sizes = [2, 512], strides = [1, 1]} : vector<2x1024xf32> to vector<2x512xf32>
    %4 = vector.extract_strided_slice %2 {offsets = [0, 512], sizes = [2, 512], strides = [1, 1]} : vector<2x1024xf32> to vector<2x512xf32>
    %c0_3 = arith.constant 0 : index
    %c0_4 = arith.constant 0 : index
    %5 = vector.load %arg2[%c0_3, %c0_4] : memref<2x16xf32, #tpu.memory_space<vmem>>, vector<2x16xf32>
    %c0_5 = arith.constant 0 : index
    %c0_6 = arith.constant 0 : index
    %6 = vector.load %arg4[%c0_5, %c0_6] : memref<16x512xf32, #tpu.memory_space<vmem>>, vector<16x512xf32>
    %cst_7 = arith.constant dense<0.000000e+00> : vector<2x512xf32>
    %7 = tpu.matmul %5, %6, %cst_7 {dimension_numbers = #tpu.dot_dimension_numbers<[1], [0], [0], [1], [0, 0, 1, 1], [], []>} : vector<2x16xf32>, vector<16x512xf32>, vector<2x512xf32> -> vector<2x512xf32>
    %8 = arith.mulf %7, %4 : vector<2x512xf32>
    %9 = arith.addf %3, %8 : vector<2x512xf32>
    %c0_8 = arith.constant 0 : index
    %c0_9 = arith.constant 0 : index
    %10 = vector.load %arg5[%c0_8, %c0_9] : memref<1x512xf32, #tpu.memory_space<vmem>>, vector<1x512xf32>
    %11 = vector.broadcast %10 : vector<1x512xf32> to vector<2x512xf32>
    %12 = arith.addf %9, %11 : vector<2x512xf32>
    %c0_10 = arith.constant 0 : index
    %c0_11 = arith.constant 0 : index
    %13 = vector.load %arg6[%c0_10, %c0_11] : memref<2x512xf32, #tpu.memory_space<vmem>>, vector<2x512xf32>
    tpu.vector_store %arg6[%c0_10, %c0_11], %12 {strides = array<i32>} : memref<2x512xf32, #tpu.memory_space<vmem>>, vector<2x512xf32>,
    return
  }
  func.func @transform_0(%arg0: i32) -> (i32, i32) {
    %c0_i32 = arith.constant 0 : i32
    %c0_i32_0 = arith.constant 0 : i32
    return %arg0, %c0_i32 : i32, i32
  }
  func.func @transform_1(%arg0: i32) -> (i32, i32) {
    %c0_i32 = arith.constant 0 : i32
    %c0_i32_0 = arith.constant 0 : i32
    return %arg0, %c0_i32 : i32, i32
  }
  func.func @transform_2(%arg0: i32) -> (i32, i32) {
    %c0_i32 = arith.constant 0 : i32
    %c0_i32_0 = arith.constant 0 : i32
    %c0_i32_1 = arith.constant 0 : i32
    return %c0_i32, %c0_i32_0 : i32, i32
  }
  func.func @transform_3(%arg0: i32) -> (i32, i32) {
    %c0_i32 = arith.constant 0 : i32
    %c0_i32_0 = arith.constant 0 : i32
    %c0_i32_1 = arith.constant 0 : i32
    return %c0_i32, %c0_i32_0 : i32, i32
  }
  func.func @transform_4(%arg0: i32) -> (i32, i32) {
    %c0_i32 = arith.constant 0 : i32
    %c0_i32_0 = arith.constant 0 : i32
    %c0_i32_1 = arith.constant 0 : i32
    return %c0_i32, %c0_i32_0 : i32, i32
  }
  func.func @transform_5(%arg0: i32) -> (i32, i32) {
    %c0_i32 = arith.constant 0 : i32
    %c0_i32_0 = arith.constant 0 : i32
    return %arg0, %c0_i32 : i32, i32
  }
}

</mosaic_0001>

<bundles_post_ra>
// kernel: tpu_custom_call.1
= control target key start
LH: loop header
LB: loop body
LE: loop exit
PB: predicated region body
PF: predicated region fallthrough
CT: control target
= control target key end

     0   :  { %10 = vsyncpa [#allocation3], 0  ;;  %s1049_s0 = inlined_call_operand.hbm [shape: f32[2,128], index: 0, kind: input, shape index: {}]   ;;  %s1050_s1 = inlined_call_operand.vmem [shape: f32[2,16], index: 1, kind: input, shape index: {}]   ;;  %s1051_s2 = inlined_call_operand.hbm [shape: f32[128,1024], index: 2, kind: input, shape index: {}]   ;;  %s1052_s3 = inlined_call_operand.hbm [shape: f32[16,512], index: 3, kind: input, shape index: {}]   ;;  %s1053_s4 = inlined_call_operand.vmem [shape: f32[1,512], index: 4, kind: input, shape index: {}]   ;;  %s1054_s5 = inlined_call_operand.hbm [shape: f32[2,512], index: 5, kind: output, shape index: {}]  }
   0x1   :  { %11 = vsyncpa [#allocation6], 0 }
   0x2   :  { %12 = vsyncpa [#allocation4], 0  ;;  %s943_s18 = smov [#allocation5]   ;;  %s849_s22 = scalar_lea.hbm %s1051_s2, 16384 }
   0x3   :  { %s30_s19 = sshll.u32 %s943_s18, 4  ;;  %p850_p0 = scmp.ne.s32.totalorder %s1051_s2, %s849_s22  ;;  %s31_s19 = int_to_ptr.vmem [resolvable:$true] %s30_s19 }
   0x4   :  { %p853_p1 = scmp.lt.u32.totalorder %s849_s22, %s1051_s2 }
   0x6   :  { %p855_p2 = pnand %p853_p1, %p850_p0 }
   0x8   :  { %858 = shalt.err (!%p855_p2)
}
   0x9   :  { %s859_s27 = scalar_lea.vmem %s31_s19, 16384  ;;  %p864_p4 = scmp.lt.s32.totalorder %s31_s19, %s31_s19 }
   0xa   :  { %p860_p3 = scmp.ne.s32.totalorder %s31_s19, %s859_s27  ;;  %p865_p5 = scmp.lt.s32.totalorder %s859_s27, %s859_s27 }
   0xc   :  { %p866_p6 = por %p865_p5, %p864_p4 }
   0xe   :  { %p867_p7 = pnand %p866_p6, %p860_p3 }
  0x10   :  { %870 = shalt.err (!%p867_p7)
}
  0x11   :  { %s944_s28 = smov 1024   ;;  %s945_s29 = smov 64  }
  0x12   :  { %36 = dma.hbm_to_vmem [thread:$0]  %s1051_s2, 16384, %s31_s19, [#allocation6], %s944_s28, %s944_s28, %s945_s29  }
  0x13   :  { %s946_s7 = smov [#allocation2]   ;;  %s947_s9 = smov [#allocation7]  }
  0x14   :  { %s19_s8 = sshll.u32 %s946_s7, 4  ;;  %s42_s10 = sshll.u32 %s947_s9, 4  ;;  %s20_s8 = int_to_ptr.vmem [resolvable:$true] %s19_s8  ;;  %s43_s10 = int_to_ptr.vmem [resolvable:$true] %s42_s10 }
  0x15   :  { %s871_s13 = scalar_lea.hbm %s1049_s0, 32 }
  0x16   :  { %p872_p8 = scmp.ne.s32.totalorder %s1049_s0, %s871_s13  ;;  %p875_p9 = scmp.lt.u32.totalorder %s871_s13, %s1049_s0 }
  0x18   :  { %p877_p10 = pnand %p875_p9, %p872_p8 }
  0x1a   :  { %880 = shalt.err (!%p877_p10)
}
  0x1b   :  { %s881_s2 = scalar_lea.vmem %s20_s8, 32  ;;  %p886_p12 = scmp.lt.s32.totalorder %s20_s8, %s20_s8 }
  0x1c   :  { %p882_p11 = scmp.ne.s32.totalorder %s20_s8, %s881_s2  ;;  %p887_p13 = scmp.lt.s32.totalorder %s881_s2, %s881_s2 }
  0x1e   :  { %p888_p0 = por %p887_p13, %p886_p12 }
  0x20   :  { %p889_p1 = pnand %p888_p0, %p882_p11 }
  0x22   :  { %892 = shalt.err (!%p889_p1)
}
  0x23   :  { %22 = dma.hbm_to_vmem [thread:$0]  %s1049_s0, 32, %s20_s8, [#allocation3]  }
  0x24   :  { %s893_s22 = scalar_lea.hbm %s1052_s3, 1024 }
  0x25   :  { %p894_p2 = scmp.ne.s32.totalorder %s1052_s3, %s893_s22  ;;  %p897_p3 = scmp.lt.u32.totalorder %s893_s22, %s1052_s3 }
  0x27   :  { %p899_p4 = pnand %p897_p3, %p894_p2 }
  0x29   :  { %902 = shalt.err (!%p899_p4)
}
  0x2a   :  { %s903_s27 = scalar_lea.vmem %s43_s10, 1024  ;;  %p908_p6 = scmp.lt.s32.totalorder %s43_s10, %s43_s10 }
  0x2b   :  { %p904_p5 = scmp.ne.s32.totalorder %s43_s10, %s903_s27  ;;  %p909_p7 = scmp.lt.s32.totalorder %s903_s27, %s903_s27 }
  0x2d   :  { %p910_p8 = por %p909_p7, %p908_p6 }
  0x2f   :  { %p911_p9 = pnand %p910_p8, %p904_p5 }
  0x31   :  { %914 = shalt.err (!%p911_p9)
}
  0x32   :  { %s948_s0 = smov 512   ;;  %s949_s28 = smov 32  }
  0x33   :  { %48 = dma.hbm_to_vmem [thread:$0]  %s1052_s3, 1024, %s43_s10, [#allocation6], %s948_s0, %s948_s0, %s949_s28  }
  0x34   :  { %937 = dma.done.wait [#allocation3], 32  }
  0x35   :  { %938 = vsyncadd [#allocation3], 4294967264 }
  0x36   :  { %939 = dma.done.wait [#allocation6], 17408  }
  0x37   :  { %940 = vsyncadd [#allocation6], 4294949888  ;;  %v950_v0 = vmov 0.0   ;;  %v62_v1 = vld [vmem:[#allocation5 + $0x8] sm:$0xff]  ;;  %v64_v3 = vld [vmem:[#allocation5 + $0x18] sm:$0xff]  ;;  %vm482_vm0 = vcmask 130048  }
  0x38   :  { %253 = vmatprep.mubr.f32.mxu0 %v950_v0  ;;  %324 = vmatprep.mubr.f32.mxu1 %v950_v0  ;;  %v70_v2 = vld [vmem:[#allocation5 + $0x48] sm:$0xff]  ;;  %v72_v5 = vld [vmem:[#allocation5 + $0x58] sm:$0xff]  ;;  %v61_v6 = vld [vmem:[#allocation5] sm:$0xff] }
  0x39   :  { %v703_v4 = vpack.c.bf16 %v70_v2, %v62_v1  ;;  %v69_v7 = vld [vmem:[#allocation5 + $0x40] sm:$0xff]  ;;  %v735_v8 = vpack.c.bf16 %v72_v5, %v64_v3  ;;  %v63_v10 = vld [vmem:[#allocation5 + $0x10] sm:$0xff]  ;;  %v78_v12 = vld [vmem:[#allocation5 + $0x88] sm:$0xff] }
  0x3a   :  { %v705_v9 = vpack.c.bf16 %v69_v7, %v61_v6  ;;  %v71_v11 = vld [vmem:[#allocation5 + $0x50] sm:$0xff]  ;;  %v86_v14 = vld [vmem:[#allocation5 + $0xc8] sm:$0xff]  ;;  %v80_v15 = vld [vmem:[#allocation5 + $0x98] sm:$0xff] }
  0x3b   :  { %704 = vmatprep.subr.bf16.mxu0 %v703_v4  ;;  %v737_v13 = vpack.c.bf16 %v71_v11, %v63_v10  ;;  %v88_v16 = vld [vmem:[#allocation5 + $0xd8] sm:$0xff]  ;;  %736 = vmatprep.subr.bf16.mxu1 %v735_v8  ;;  %v707_v17 = vpack.c.bf16 %v86_v14, %v78_v12  ;;  %v77_v19 = vld [vmem:[#allocation5 + $0x80] sm:$0xff]  ;;  %v79_v21 = vld [vmem:[#allocation5 + $0x90] sm:$0xff] }
  0x3c   :  { %706 = vmatpush1.bf16.msra.mxu0 %v705_v9  ;;  %v739_v18 = vpack.c.bf16 %v88_v16, %v80_v15  ;;  %v85_v20 = vld [vmem:[#allocation5 + $0xc0] sm:$0xff]  ;;  %v87_v23 = vld [vmem:[#allocation5 + $0xd0] sm:$0xff]  ;;  %v94_v24 = vld [vmem:[#allocation5 + $0x108] sm:$0xff] }
  0x3d   :  { %738 = vmatpush1.bf16.msra.mxu1 %v737_v13  ;;  %v709_v22 = vpack.c.bf16 %v85_v20, %v77_v19  ;;  %v102_v25 = vld [vmem:[#allocation5 + $0x148] sm:$0xff]  ;;  %708 = vmatprep.subr.bf16.mxu0 %v707_v17  ;;  %v741_v26 = vpack.c.bf16 %v87_v23, %v79_v21  ;;  %v96_v28 = vld [vmem:[#allocation5 + $0x118] sm:$0xff]  ;;  %v93_v30 = vld [vmem:[#allocation5 + $0x100] sm:$0xff] }
  0x3e   :  { %740 = vmatprep.subr.bf16.mxu1 %v739_v18  ;;  %v711_v27 = vpack.c.bf16 %v102_v25, %v94_v24  ;;  %v104_v29 = vld [vmem:[#allocation5 + $0x158] sm:$0xff]  ;;  %v101_v32 = vld [vmem:[#allocation5 + $0x140] sm:$0xff]  ;;  %v95_v33 = vld [vmem:[#allocation5 + $0x110] sm:$0xff] }
  0x3f   :  { %v743_v31 = vpack.c.bf16 %v104_v29, %v96_v28  ;;  %v103_v34 = vld [vmem:[#allocation5 + $0x150] sm:$0xff]  ;;  %v713_v35 = vpack.c.bf16 %v101_v32, %v93_v30  ;;  %v110_v36 = vld [vmem:[#allocation5 + $0x188] sm:$0xff]  ;;  %v112_v38 = vld [vmem:[#allocation5 + $0x198] sm:$0xff] }
  0x40   :  { %710 = vmatpush1.bf16.msra.mxu0 %v709_v22  ;;  %v118_v37 = vld [vmem:[#allocation5 + $0x1c8] sm:$0xff]  ;;  %v745_v39 = vpack.c.bf16 %v103_v34, %v95_v33  ;;  %v120_v41 = vld [vmem:[#allocation5 + $0x1d8] sm:$0xff]  ;;  %v109_v42 = vld [vmem:[#allocation5 + $0x180] sm:$0xff] }
  0x41   :  { %742 = vmatpush1.bf16.msra.mxu1 %v741_v26  ;;  %712 = vmatprep.subr.bf16.mxu0 %v711_v27  ;;  %v715_v40 = vpack.c.bf16 %v118_v37, %v110_v36  ;;  %v117_v43 = vld [vmem:[#allocation5 + $0x1c0] sm:$0xff]  ;;  %v747_v44 = vpack.c.bf16 %v120_v41, %v112_v38  ;;  %v111_v45 = vld [vmem:[#allocation5 + $0x190] sm:$0xff]  ;;  %v126_v47 = vld [vmem:[#allocation5 + $0x208] sm:$0xff] }
  0x42   :  { %744 = vmatprep.subr.bf16.mxu1 %v743_v31  ;;  %v119_v46 = vld [vmem:[#allocation5 + $0x1d0] sm:$0xff]  ;;  %v134_v48 = vld [vmem:[#allocation5 + $0x248] sm:$0xff]  ;;  %v128_v49 = vld [vmem:[#allocation5 + $0x218] sm:$0xff]  ;;  %v717_v51 = vpack.c.bf16 %v117_v43, %v109_v42 }
  0x43   :  { %v136_v50 = vld [vmem:[#allocation5 + $0x258] sm:$0xff]  ;;  %v749_v52 = vpack.c.bf16 %v119_v46, %v111_v45  ;;  %v719_v53 = vpack.c.bf16 %v134_v48, %v126_v47  ;;  %v125_v54 = vld [vmem:[#allocation5 + $0x200] sm:$0xff]  ;;  %v127_v56 = vld [vmem:[#allocation5 + $0x210] sm:$0xff] }
  0x44   :  { %714 = vmatpush1.bf16.msra.mxu0 %v713_v35  ;;  %v133_v55 = vld [vmem:[#allocation5 + $0x240] sm:$0xff]  ;;  %v751_v57 = vpack.c.bf16 %v136_v50, %v128_v49  ;;  %v135_v58 = vld [vmem:[#allocation5 + $0x250] sm:$0xff]  ;;  %v142_v59 = vld [vmem:[#allocation5 + $0x288] sm:$0xff] }
  0x45   :  { %746 = vmatpush1.bf16.msra.mxu1 %v745_v39  ;;  %716 = vmatprep.subr.bf16.mxu0 %v715_v40  ;;  %v150_v60 = vld [vmem:[#allocation5 + $0x2c8] sm:$0xff]  ;;  %v144_v61 = vld [vmem:[#allocation5 + $0x298] sm:$0xff]  ;;  %v721_v63 = vpack.c.bf16 %v133_v55, %v125_v54  ;;  %v753_v1 = vpack.c.bf16 %v135_v58, %v127_v56  ;;  %v141_v3 = vld [vmem:[#allocation5 + $0x280] sm:$0xff] }
  0x46   :  { %748 = vmatprep.subr.bf16.mxu1 %v747_v44  ;;  %v152_v62 = vld [vmem:[#allocation5 + $0x2d8] sm:$0xff]  ;;  %v723_v2 = vpack.c.bf16 %v150_v60, %v142_v59  ;;  %v149_v4 = vld [vmem:[#allocation5 + $0x2c0] sm:$0xff]  ;;  %v143_v5 = vld [vmem:[#allocation5 + $0x290] sm:$0xff] }
  0x47   :  { %v755_v6 = vpack.c.bf16 %v152_v62, %v144_v61  ;;  %v151_v7 = vld [vmem:[#allocation5 + $0x2d0] sm:$0xff]  ;;  %v158_v8 = vld [vmem:[#allocation5 + $0x308] sm:$0xff]  ;;  %v160_v10 = vld [vmem:[#allocation5 + $0x318] sm:$0xff]  ;;  %v725_v12 = vpack.c.bf16 %v149_v4, %v141_v3 }
  0x48   :  { %718 = vmatpush1.bf16.msra.mxu0 %v717_v51  ;;  %v166_v9 = vld [vmem:[#allocation5 + $0x348] sm:$0xff]  ;;  %v168_v11 = vld [vmem:[#allocation5 + $0x358] sm:$0xff]  ;;  %v757_v13 = vpack.c.bf16 %v151_v7, %v143_v5  ;;  %v157_v15 = vld [vmem:[#allocation5 + $0x300] sm:$0xff] }
  0x49   :  { %750 = vmatpush1.bf16.msra.mxu1 %v749_v52  ;;  %720 = vmatprep.subr.bf16.mxu0 %v719_v53  ;;  %v727_v14 = vpack.c.bf16 %v166_v9, %v158_v8  ;;  %v165_v16 = vld [vmem:[#allocation5 + $0x340] sm:$0xff]  ;;  %v159_v17 = vld [vmem:[#allocation5 + $0x310] sm:$0xff]  ;;  %v759_v18 = vpack.c.bf16 %v168_v11, %v160_v10  ;;  %v174_v20 = vld [vmem:[#allocation5 + $0x388] sm:$0xff] }
  0x4a   :  { %752 = vmatprep.subr.bf16.mxu1 %v751_v57  ;;  %v167_v19 = vld [vmem:[#allocation5 + $0x350] sm:$0xff]  ;;  %v182_v21 = vld [vmem:[#allocation5 + $0x3c8] sm:$0xff]  ;;  %v176_v22 = vld [vmem:[#allocation5 + $0x398] sm:$0xff]  ;;  %v729_v24 = vpack.c.bf16 %v165_v16, %v157_v15 }
  0x4b   :  { %v184_v23 = vld [vmem:[#allocation5 + $0x3d8] sm:$0xff]  ;;  %v761_v25 = vpack.c.bf16 %v167_v19, %v159_v17  ;;  %v731_v26 = vpack.c.bf16 %v182_v21, %v174_v20  ;;  %v173_v27 = vld [vmem:[#allocation5 + $0x380] sm:$0xff]  ;;  %v175_v29 = vld [vmem:[#allocation5 + $0x390] sm:$0xff] }
  0x4c   :  { %722 = vmatpush1.bf16.msra.mxu0 %v721_v63  ;;  %v181_v28 = vld [vmem:[#allocation5 + $0x3c0] sm:$0xff]  ;;  %v763_v30 = vpack.c.bf16 %v184_v23, %v176_v22  ;;  %v183_v31 = vld [vmem:[#allocation5 + $0x3d0] sm:$0xff]  ;;  %v66_v32 = vld [vmem:[#allocation5 + $0x28] sm:$0xff] }
  0x4d   :  { %754 = vmatpush1.bf16.msra.mxu1 %v753_v1  ;;  %724 = vmatprep.subr.bf16.mxu0 %v723_v2  ;;  %v74_v33 = vld [vmem:[#allocation5 + $0x68] sm:$0xff]  ;;  %v68_v34 = vld [vmem:[#allocation5 + $0x38] sm:$0xff]  ;;  %v733_v36 = vpack.c.bf16 %v181_v28, %v173_v27  ;;  %v765_v37 = vpack.c.bf16 %v183_v31, %v175_v29  ;;  %v65_v39 = vld [vmem:[#allocation5 + $0x20] sm:$0xff] }
  0x4e   :  { %756 = vmatprep.subr.bf16.mxu1 %v755_v6  ;;  %v76_v35 = vld [vmem:[#allocation5 + $0x78] sm:$0xff]  ;;  %v767_v38 = vpack.c.bf16 %v74_v33, %v66_v32  ;;  %v73_v40 = vld [vmem:[#allocation5 + $0x60] sm:$0xff]  ;;  %v67_v41 = vld [vmem:[#allocation5 + $0x30] sm:$0xff] }
  0x4f   :  { %v799_v42 = vpack.c.bf16 %v76_v35, %v68_v34  ;;  %v75_v43 = vld [vmem:[#allocation5 + $0x70] sm:$0xff]  ;;  %v82_v44 = vld [vmem:[#allocation5 + $0xa8] sm:$0xff]  ;;  %v84_v46 = vld [vmem:[#allocation5 + $0xb8] sm:$0xff]  ;;  %v769_v49 = vpack.c.bf16 %v73_v40, %v65_v39 }
  0x50   :  { %726 = vmatpush1.bf16.msra.mxu0 %v725_v12  ;;  %v90_v45 = vld [vmem:[#allocation5 + $0xe8] sm:$0xff]  ;;  %v92_v47 = vld [vmem:[#allocation5 + $0xf8] sm:$0xff]  ;;  %v801_v50 = vpack.c.bf16 %v75_v43, %v67_v41  ;;  %v81_v52 = vld [vmem:[#allocation5 + $0xa0] sm:$0xff] }
  0x51   :  { %758 = vmatpush1.bf16.msra.mxu1 %v757_v13  ;;  %728 = vmatprep.subr.bf16.mxu0 %v727_v14  ;;  %v1021_v48 = vld [vmem:[#allocation2] sm:$0x3]  ;;  %v771_v51 = vpack.c.bf16 %v90_v45, %v82_v44  ;;  %v89_v53 = vld [vmem:[#allocation5 + $0xe0] sm:$0xff]  ;;  %v83_v54 = vld [vmem:[#allocation5 + $0xb0] sm:$0xff]  ;;  %v803_v55 = vpack.c.bf16 %v92_v47, %v84_v46 }
  0x52   :  { %760 = vmatprep.subr.bf16.mxu1 %v759_v18  ;;  %v91_v56 = vld [vmem:[#allocation5 + $0xf0] sm:$0xff]  ;;  %v98_v57 = vld [vmem:[#allocation5 + $0x128] sm:$0xff]  ;;  %v100_v59 = vld [vmem:[#allocation5 + $0x138] sm:$0xff]  ;;  %v773_v61 = vpack.c.bf16 %v89_v53, %v81_v52 }
  0x53   :  { %v106_v58 = vld [vmem:[#allocation5 + $0x168] sm:$0xff]  ;;  %v108_v60 = vld [vmem:[#allocation5 + $0x178] sm:$0xff]  ;;  %v805_v62 = vpack.c.bf16 %v91_v56, %v83_v54  ;;  %v97_v1 = vld [vmem:[#allocation5 + $0x120] sm:$0xff] }
  0x54   :  { %730 = vmatpush1.bf16.msra.mxu0 %v729_v24  ;;  %v775_v63 = vpack.c.bf16 %v106_v58, %v98_v57  ;;  %v105_v2 = vld [vmem:[#allocation5 + $0x160] sm:$0xff]  ;;  %v99_v3 = vld [vmem:[#allocation5 + $0x130] sm:$0xff]  ;;  %v807_v4 = vpack.c.bf16 %v108_v60, %v100_v59  ;;  %v114_v6 = vld [vmem:[#allocation5 + $0x1a8] sm:$0xff] }
  0x55   :  { %762 = vmatpush1.bf16.msra.mxu1 %v761_v25  ;;  %732 = vmatprep.subr.bf16.mxu0 %v731_v26  ;;  %v107_v5 = vld [vmem:[#allocation5 + $0x170] sm:$0xff]  ;;  %v122_v7 = vld [vmem:[#allocation5 + $0x1e8] sm:$0xff]  ;;  %v116_v8 = vld [vmem:[#allocation5 + $0x1b8] sm:$0xff]  ;;  %v777_v10 = vpack.c.bf16 %v105_v2, %v97_v1 }
  0x56   :  { %764 = vmatprep.subr.bf16.mxu1 %v763_v30  ;;  %v124_v9 = vld [vmem:[#allocation5 + $0x1f8] sm:$0xff]  ;;  %v809_v11 = vpack.c.bf16 %v107_v5, %v99_v3  ;;  %v779_v12 = vpack.c.bf16 %v122_v7, %v114_v6  ;;  %v113_v13 = vld [vmem:[#allocation5 + $0x1a0] sm:$0xff]  ;;  %v115_v15 = vld [vmem:[#allocation5 + $0x1b0] sm:$0xff] }
  0x57   :  { %v121_v14 = vld [vmem:[#allocation5 + $0x1e0] sm:$0xff]  ;;  %v811_v16 = vpack.c.bf16 %v124_v9, %v116_v8  ;;  %v123_v17 = vld [vmem:[#allocation5 + $0x1f0] sm:$0xff]  ;;  %v130_v18 = vld [vmem:[#allocation5 + $0x228] sm:$0xff] }
  0x58   :  { %734 = vmatpush1.bf16.msra.mxu0 %v733_v36  ;;  %v138_v19 = vld [vmem:[#allocation5 + $0x268] sm:$0xff]  ;;  %v132_v20 = vld [vmem:[#allocation5 + $0x238] sm:$0xff]  ;;  %v781_v22 = vpack.c.bf16 %v121_v14, %v113_v13  ;;  %v813_v23 = vpack.c.bf16 %v123_v17, %v115_v15  ;;  %v129_v25 = vld [vmem:[#allocation5 + $0x220] sm:$0xff] }
  0x59   :  { %766 = vmatpush1.bf16.msra.mxu1 %v765_v37  ;;  %768 = vmatprep.subr.bf16.mxu0 %v767_v38  ;;  %v140_v21 = vld [vmem:[#allocation5 + $0x278] sm:$0xff]  ;;  %v783_v24 = vpack.c.bf16 %v138_v19, %v130_v18  ;;  %v137_v26 = vld [vmem:[#allocation5 + $0x260] sm:$0xff]  ;;  %v131_v27 = vld [vmem:[#allocation5 + $0x230] sm:$0xff] }
  0x5a   :  { %800 = vmatprep.subr.bf16.mxu1 %v799_v42  ;;  %v815_v28 = vpack.c.bf16 %v140_v21, %v132_v20  ;;  %v139_v29 = vld [vmem:[#allocation5 + $0x270] sm:$0xff]  ;;  %v146_v30 = vld [vmem:[#allocation5 + $0x2a8] sm:$0xff]  ;;  %v148_v32 = vld [vmem:[#allocation5 + $0x2b8] sm:$0xff]  ;;  %v785_v34 = vpack.c.bf16 %v137_v26, %v129_v25 }
  0x5b   :  { %254 = vmatmul.mubr.f32.vlgmr.msra.gmra.mrb[0].mxu0 %v1021_v48  ;;  %v154_v31 = vld [vmem:[#allocation5 + $0x2e8] sm:$0xff]  ;;  %v156_v33 = vld [vmem:[#allocation5 + $0x2f8] sm:$0xff]  ;;  %v817_v35 = vpack.c.bf16 %v139_v29, %v131_v27  ;;  %v145_v37 = vld [vmem:[#allocation5 + $0x2a0] sm:$0xff] }
  0x5c   :  { %325 = vmatmul.mubr.f32.vlgmr.msra.gmra.mrb[0].mxu1 %v1021_v48  ;;  %770 = vmatpush1.bf16.msra.mxu0 %v769_v49  ;;  %v787_v36 = vpack.c.bf16 %v154_v31, %v146_v30  ;;  %v153_v38 = vld [vmem:[#allocation5 + $0x2e0] sm:$0xff]  ;;  %v147_v39 = vld [vmem:[#allocation5 + $0x2b0] sm:$0xff]  ;;  %v819_v40 = vpack.c.bf16 %v156_v33, %v148_v32  ;;  %v162_v42 = vld [vmem:[#allocation5 + $0x328] sm:$0xff] }
  0x5d   :  { %802 = vmatpush1.bf16.msra.mxu1 %v801_v50  ;;  %772 = vmatprep.subr.bf16.mxu0 %v771_v51  ;;  %v155_v41 = vld [vmem:[#allocation5 + $0x2f0] sm:$0xff]  ;;  %v170_v43 = vld [vmem:[#allocation5 + $0x368] sm:$0xff]  ;;  %v164_v44 = vld [vmem:[#allocation5 + $0x338] sm:$0xff]  ;;  %v789_v46 = vpack.c.bf16 %v153_v38, %v145_v37 }
  0x5e   :  { %804 = vmatprep.subr.bf16.mxu1 %v803_v55  ;;  %395 = vmatprep.mubr.f32.mxu0 %v950_v0  ;;  %v172_v45 = vld [vmem:[#allocation5 + $0x378] sm:$0xff]  ;;  %v821_v47 = vpack.c.bf16 %v155_v41, %v147_v39  ;;  %v791_v49 = vpack.c.bf16 %v170_v43, %v162_v42  ;;  %v161_v50 = vld [vmem:[#allocation5 + $0x320] sm:$0xff]  ;;  %v163_v52 = vld [vmem:[#allocation5 + $0x330] sm:$0xff] }
  0x5f   :  { %466 = vmatprep.mubr.f32.mxu1 %v950_v0  ;;  %v169_v51 = vld [vmem:[#allocation5 + $0x360] sm:$0xff]  ;;  %v823_v53 = vpack.c.bf16 %v172_v45, %v164_v44  ;;  %v171_v54 = vld [vmem:[#allocation5 + $0x370] sm:$0xff]  ;;  %v178_v55 = vld [vmem:[#allocation5 + $0x3a8] sm:$0xff] }
  0x60   :  { %774 = vmatpush1.bf16.msra.mxu0 %v773_v61  ;;  %v186_v56 = vld [vmem:[#allocation5 + $0x3e8] sm:$0xff]  ;;  %v180_v57 = vld [vmem:[#allocation5 + $0x3b8] sm:$0xff]  ;;  %v793_v59 = vpack.c.bf16 %v169_v51, %v161_v50  ;;  %v825_v60 = vpack.c.bf16 %v171_v54, %v163_v52  ;;  %v179_v1 = vld [vmem:[#allocation5 + $0x3b0] sm:$0xff] }
  0x61   :  { %806 = vmatpush1.bf16.msra.mxu1 %v805_v62  ;;  %776 = vmatprep.subr.bf16.mxu0 %v775_v63  ;;  %v188_v58 = vld [vmem:[#allocation5 + $0x3f8] sm:$0xff]  ;;  %v795_v61 = vpack.c.bf16 %v186_v56, %v178_v55  ;;  %v177_v62 = vld [vmem:[#allocation5 + $0x3a0] sm:$0xff]  ;;  %v187_v3 = vld [vmem:[#allocation5 + $0x3f0] sm:$0xff] }
  0x62   :  { %808 = vmatprep.subr.bf16.mxu1 %v807_v4  ;;  %v185_v63 = vld [vmem:[#allocation5 + $0x3e0] sm:$0xff]  ;;  %v827_v2 = vpack.c.bf16 %v188_v58, %v180_v57  ;;  %v475_v4 = vld [vmem:[#allocation7 + $0x8] sm:$0xff]  ;;  %v477_v6 = vld [vmem:[#allocation7 + $0x18] sm:$0xff]  ;;  %v829_v9 = vpack.c.bf16 %v187_v3, %v179_v1 }
  0x63   :  { %v479_v5 = vld [vmem:[#allocation7 + $0x28] sm:$0xff]  ;;  %v481_v7 = vld [vmem:[#allocation7 + $0x38] sm:$0xff]  ;;  %v797_v8 = vpack.c.bf16 %v185_v63, %v177_v62  ;;  %v476_v14 = vld [vmem:[#allocation7 + $0x10] sm:$0xff] }
  0x64   :  { %778 = vmatpush1.bf16.msra.mxu0 %v777_v10  ;;  %v831_v10 = vpack.c.bf16 %v479_v5, %v475_v4  ;;  %v835_v13 = vpack.c.bf16 %v481_v7, %v477_v6  ;;  %v480_v15 = vld [vmem:[#allocation7 + $0x30] sm:$0xff] }
  0x65   :  { %810 = vmatpush1.bf16.msra.mxu1 %v809_v11  ;;  %780 = vmatprep.subr.bf16.mxu0 %v779_v12  ;;  %v474_v11 = vld [vmem:[#allocation7] sm:$0xff]  ;;  %v837_v17 = vpack.c.bf16 %v480_v15, %v476_v14  ;;  %v473_v18 = vld [vmem:[%s1050_s1] sm:$0x3] }
  0x66   :  { %812 = vmatprep.subr.bf16.mxu1 %v811_v16  ;;  %v478_v12 = vld [vmem:[#allocation7 + $0x20] sm:$0xff]  ;;  %v636_v30 = vld [vmem:[%s1053_s4] sm:$0xf]  ;;  %s952_s4 = smov [#allocation8]  }
  0x67   :  { %v833_v16 = vpack.c.bf16 %v478_v12, %v474_v11  ;;  %s691_s8 = sshll.u32 %s952_s4, 4  ;;  %s692_s8 = int_to_ptr.vmem [resolvable:$true] %s691_s8 }
  0x68   :  { %782 = vmatpush1.bf16.msra.mxu0 %v781_v22  ;;  %s915_s9 = scalar_lea.vmem %s692_s8, 128  ;;  %p920_p11 = scmp.lt.s32.totalorder %s692_s8, %s692_s8 }
  0x69   :  { %814 = vmatpush1.bf16.msra.mxu1 %v813_v23  ;;  %784 = vmatprep.subr.bf16.mxu0 %v783_v24  ;;  %v638_v23 = vlaneseq  ;;  %p916_p10 = scmp.ne.s32.totalorder %s692_s8, %s915_s9  ;;  %p921_p12 = scmp.lt.s32.totalorder %s915_s9, %s915_s9 }
  0x6a   :  { %816 = vmatprep.subr.bf16.mxu1 %v815_v28 }
  0x6b   :  { %v639_v24 = vshrl.u32 %v638_v23, 7  ;;  %p922_p13 = por %p921_p12, %p920_p11 }
  0x6c   :  { %786 = vmatpush1.bf16.msra.mxu0 %v785_v34 }
  0x6d   :  { %818 = vmatpush1.bf16.msra.mxu1 %v817_v35  ;;  %788 = vmatprep.subr.bf16.mxu0 %v787_v36  ;;  %v640_v27 = vsub.s32 0, %v639_v24  ;;  %v648_v28 = vsub.s32 2, %v639_v24  ;;  %v644_v31 = vsub.s32 1, %v639_v24  ;;  %v652_v33 = vsub.s32 3, %v639_v24  ;;  %p923_p0 = pnand %p922_p13, %p916_p10 }
  0x6e   :  { %820 = vmatprep.subr.bf16.mxu1 %v819_v40 }
  0x6f   :  { %v641_v36 = vrot.slane %v636_v30, %v640_v27  ;;  %v649_v38 = vrot.slane %v636_v30, %v648_v28  ;;  %v645_v42 = vrot.slane %v636_v30, %v644_v31 }
  0x70   :  { %790 = vmatpush1.bf16.msra.mxu0 %v789_v46 }
  0x71   :  { %822 = vmatpush1.bf16.msra.mxu1 %v821_v47  ;;  %792 = vmatprep.subr.bf16.mxu0 %v791_v49  ;;  %v653_v47 = vrot.slane %v636_v30, %v652_v33 }
  0x72   :  { %824 = vmatprep.subr.bf16.mxu1 %v823_v53 }
  0x74   :  { %794 = vmatpush1.bf16.msra.mxu0 %v793_v59 }
  0x75   :  { %826 = vmatpush1.bf16.msra.mxu1 %v825_v60  ;;  %796 = vmatprep.subr.bf16.mxu0 %v795_v61 }
  0x76   :  { %828 = vmatprep.subr.bf16.mxu1 %v827_v2 }
  0x78   :  { %798 = vmatpush1.bf16.msra.mxu0 %v797_v8 }
  0x79   :  { %830 = vmatpush1.bf16.msra.mxu1 %v829_v9  ;;  %832 = vmatprep.subr.bf16.mxu0 %v831_v10 }
  0x7a   :  { %836 = vmatprep.subr.bf16.mxu1 %v835_v13 }
  0x7b   :  { %396 = vmatmul.mubr.f32.vlgmr.msra.gmra.mrb[2].mxu0 %v1021_v48 }
  0x7c   :  { %467 = vmatmul.mubr.f32.vlgmr.msra.gmra.mrb[2].mxu1 %v1021_v48  ;;  %834 = vmatpush1.bf16.msra.mxu0 %v833_v16 }
  0x7d   :  { %838 = vmatpush1.bf16.msra.mxu1 %v837_v17  ;;  %550 = vmatprep.mubr.f32.mxu0 %v950_v0 }
  0x7e   :  { %621 = vmatprep.mubr.f32.mxu1 %v950_v0  ;;  %v951_v0 = vmov 1983009808  }
  0x7f   :  { %701 = vmatmul.mubr.msk.f32.vlgmr.msra.gmra.mrb[4].mxu0 %vm482_vm0, %v473_v18  ;;  %v669_v32 = vunpack.c.l.s4 %v951_v0 }
  0x80   :  { %702 = vmatmul.mubr.msk.f32.vlgmr.msra.gmra.mrb[4].mxu1 %vm482_vm0, %v473_v18 }
  0x81   :  { %v670_v44 = vunpack.c.0.s8 %v669_v32 }
  0x83   :  { %v673_v55 = vsub.s32 %v670_v44, %v639_v24 }
 0x12e   :  { %v255_v19 = vpop.f32.mrb[0].mxu0 }
 0x12f   :  { %v326_v20 = vpop.f32.mrb[0].mxu1  ;;  %v257_v21 = vpop.f32.mrb[1].mxu0 }
 0x130   :  { %v328_v22 = vpop.f32.mrb[1].mxu1 }
 0x14e   :  { %v397_v48 = vpop.f32.mrb[2].mxu0 }
 0x14f   :  { %v468_v25 = vpop.f32.mrb[2].mxu1  ;;  %v399_v26 = vpop.f32.mrb[3].mxu0 }
 0x150   :  { %v470_v29 = vpop.f32.mrb[3].mxu1 }
 0x152   :  { %v552_v34 = vpop.f32.mrb[4].mxu0 }
 0x153   :  { %v628_v35 = vmul.f32 %v552_v34, %v397_v48  ;;  %v623_v37 = vpop.f32.mrb[4].mxu1  ;;  %v554_v39 = vpop.f32.mrb[5].mxu0 }
 0x154   :  { %v630_v40 = vmul.f32 %v623_v37, %v468_v25  ;;  %v629_v41 = vmul.f32 %v554_v39, %v399_v26  ;;  %v625_v43 = vpop.f32.mrb[5].mxu1 }
 0x155   :  { %v632_v45 = vadd.f32 %v628_v35, %v255_v19  ;;  %v631_v46 = vmul.f32 %v625_v43, %v470_v29 }
 0x156   :  { %v634_v49 = vadd.f32 %v630_v40, %v326_v20  ;;  %v633_v50 = vadd.f32 %v629_v41, %v257_v21 }
 0x157   :  { %v658_v51 = vadd.f32 %v641_v36, %v632_v45  ;;  %v635_v52 = vadd.f32 %v631_v46, %v328_v22 }
 0x158   :  { %v660_v53 = vadd.f32 %v649_v38, %v634_v49  ;;  %v659_v54 = vadd.f32 %v645_v42, %v633_v50 }
 0x159   :  { %v661_v56 = vadd.f32 %v653_v47, %v635_v52 }
 0x15a   :  { %v666_v57 = vcombine.low %v658_v51, %v659_v54 }
 0x15b   :  { %v667_v58 = vcombine.low %v660_v53, %v661_v56 }
 0x15c   :  { %v674_v59 = vrot.slane %v666_v57, %v673_v55 }
 0x15d   :  { %v681_v60 = vrot.slane %v667_v58, %v673_v55 }
 0x15f   :  { %v682_v61 = vcombine.low %v674_v59, %v681_v60 }
 0x161   :  { %684 = vst [vmem:[#allocation8] sm:$0xff] %v682_v61 }
 0x162   :  { %926 = shalt.err (!%p923_p0)
}
 0x163   :  { %s927_s12 = scalar_lea.hbm %s1054_s5, 128 }
 0x164   :  { %p928_p1 = scmp.ne.s32.totalorder %s1054_s5, %s927_s12  ;;  %p931_p2 = scmp.lt.u32.totalorder %s927_s12, %s1054_s5 }
 0x166   :  { %p933_p3 = pnand %p931_p2, %p928_p1 }
 0x168   :  { %936 = shalt.err (!%p933_p3)
}
 0x169   :  { %694 = dma.vmem_to_hbm [thread:$0]  %s692_s8, 128, %s1054_s5, [#allocation4]  }
 0x16a   :  { %941 = dma.done.wait [#allocation4], 128  }
 0x16b   :  { %942 = vsyncadd [#allocation4], 4294967168 }
 0x16c   :  { %698 = vsyncpa [#allocation3], 1 }
 0x16d   :  { %699 = vsyncpa [#allocation6], 1 }
 0x16e   :  { %700 = vsyncpa [#allocation4], 1 }

</bundles_post_ra>
